<compile_context>
chip_gen: v6e
topology: v6e:2x2x1
jax: 0.10.0
libtpu: 0.0.40
codegen_flags: <defaults>
</compile_context>

<pallas_src>
import functools

import jax
import jax.numpy as jnp
from jax.experimental import pallas as pl
from jax.experimental.pallas import tpu as pltpu

IN_DIM = 11
HIDDEN = 128
NUM_ACTIONS = 4      # len(action_list) is 0 in the source; see TODO above.
HEAD_PAD = 128       # lane-dense head width (zero-padded columns, sliced off).
MAX_TILE_B = 512     # batch tile; >=256 keeps the v6e/v7x MXU fed, >=8 sublane-legal.


def _mlp_kernel(x_ref, w1_ref, b1_ref, w2_ref, b2_ref, w3_ref, b3_ref, out_ref):
    # fc1 + ReLU  (MXU matmul, f32 accumulation)
    h1 = jnp.dot(x_ref[...], w1_ref[...], preferred_element_type=jnp.float32)
    h1 = jnp.maximum(h1 + b1_ref[...], 0.0)
    # fc2 + ReLU
    h2 = jnp.dot(h1, w2_ref[...], preferred_element_type=jnp.float32)
    h2 = jnp.maximum(h2 + b2_ref[...], 0.0)
    # head (no activation); lane-padded to HEAD_PAD columns for dense stores
    out = jnp.dot(h2, w3_ref[...], preferred_element_type=jnp.float32)
    out_ref[...] = (out + b3_ref[...]).astype(out_ref.dtype)


@functools.partial(jax.jit, static_argnames=("tile_b",))
def reacher_dqn_forward(x, params, tile_b=MAX_TILE_B):
    """x: (B, 11) float32 -> (B, NUM_ACTIONS) float32."""
    w1, b1, w2, b2, w3p, b3p = params  # w3p/b3p are lane-padded to HEAD_PAD
    B = x.shape[0]
    # Pick a sublane-legal tile (multiple of 8) no larger than needed.
    tile_b = int(min(tile_b, max(8, ((B + 7) // 8) * 8)))
    grid = (pl.cdiv(B, tile_b),)

    flops = 2 * B * (IN_DIM * HIDDEN + HIDDEN * HIDDEN + HIDDEN * HEAD_PAD)
    bytes_accessed = 4 * (
        B * IN_DIM + B * HEAD_PAD                      # x in, out
        + IN_DIM * HIDDEN + HIDDEN                     # w1, b1
        + HIDDEN * HIDDEN + HIDDEN                     # w2, b2
        + HIDDEN * HEAD_PAD + HEAD_PAD                 # w3, b3
    )

    out = pl.pallas_call(
        _mlp_kernel,
        out_shape=jax.ShapeDtypeStruct((B, HEAD_PAD), jnp.float32),
        grid=grid,
        in_specs=[
            pl.BlockSpec((tile_b, IN_DIM), lambda i: (i, 0)),      # x tile
            pl.BlockSpec((IN_DIM, HIDDEN), lambda i: (0, 0)),      # w1 (resident)
            pl.BlockSpec((1, HIDDEN), lambda i: (0, 0)),           # b1 (resident)
            pl.BlockSpec((HIDDEN, HIDDEN), lambda i: (0, 0)),      # w2 (resident)
            pl.BlockSpec((1, HIDDEN), lambda i: (0, 0)),           # b2 (resident)
            pl.BlockSpec((HIDDEN, HEAD_PAD), lambda i: (0, 0)),    # w3 (resident)
            pl.BlockSpec((1, HEAD_PAD), lambda i: (0, 0)),         # b3 (resident)
        ],
        out_specs=pl.BlockSpec((tile_b, HEAD_PAD), lambda i: (i, 0)),
        compiler_params=pltpu.CompilerParams(
            dimension_semantics=("parallel",),   # v7x: shard batch tiles over 2 TCs
        ),
        cost_estimate=pl.CostEstimate(
            flops=flops, transcendentals=0, bytes_accessed=bytes_accessed),
    )(x, w1, b1, w2, b2, w3p, b3p)

    # Drop the zero-padded head columns; rows are already exact (masked stores
    # on the ragged last batch tile never write past B).
    return out[:, :NUM_ACTIONS]


def init_params(key):
    """Deterministic init mirroring the PyTorch __init__ (weights stored as (in, out)).

    The head weight/bias are zero-padded from NUM_ACTIONS to HEAD_PAD lanes so
    the kernel's final store is lane-dense; padded columns are exactly zero.
    """
    k1, k2, k3, k4 = jax.random.split(key, 4)
    # fc1: uniform(-0.003, 0.003), bias = 0.01
    w1 = jax.random.uniform(k1, (IN_DIM, HIDDEN), jnp.float32, -0.003, 0.003)
    b1 = jnp.full((1, HIDDEN), 0.01, jnp.float32)
    # fc2: uniform(-0.003, 0.003), bias = 0.01
    w2 = jax.random.uniform(k2, (HIDDEN, HIDDEN), jnp.float32, -0.003, 0.003)
    b2 = jnp.full((1, HIDDEN), 0.01, jnp.float32)
    # head: PyTorch default Linear init: uniform(-1/sqrt(fan_in), 1/sqrt(fan_in))
    bound = 1.0 / jnp.sqrt(jnp.float32(HIDDEN))
    w3 = jax.random.uniform(k3, (HIDDEN, NUM_ACTIONS), jnp.float32, -bound, bound)
    b3 = jax.random.uniform(k4, (1, NUM_ACTIONS), jnp.float32, -bound, bound)
    # Lane-pad the head to HEAD_PAD output columns with zeros.
    w3p = jnp.zeros((HIDDEN, HEAD_PAD), jnp.float32).at[:, :NUM_ACTIONS].set(w3)
    b3p = jnp.zeros((1, HEAD_PAD), jnp.float32).at[:, :NUM_ACTIONS].set(b3)
    return (w1, b1, w2, b2, w3p, b3p)


def reference_forward(x, params):
    w1, b1, w2, b2, w3p, b3p = params
    h1 = jnp.maximum(x @ w1 + b1, 0.0)
    h2 = jnp.maximum(h1 @ w2 + b2, 0.0)
    return (h2 @ w3p + b3p)[:, :NUM_ACTIONS]


if __name__ == "__main__":
    key = jax.random.PRNGKey(0)
    pkey, xkey = jax.random.split(key)
    params = init_params(pkey)

    B = 2
    x = jax.random.normal(xkey, (B, IN_DIM), jnp.float32)

    out = reacher_dqn_forward(x, params)
    out = jax.block_until_ready(out)

    ref = reference_forward(x, params)
    assert out.shape == (B, NUM_ACTIONS), out.shape
    assert jnp.allclose(out, ref, atol=1e-5, rtol=1e-5), (out, ref)

    # Also exercise a multi-tile, ragged batch to validate the grid path.
    B2 = 1000
    x2 = jax.random.normal(xkey, (B2, IN_DIM), jnp.float32)
    out2 = jax.block_until_ready(reacher_dqn_forward(x2, params))
    ref2 = reference_forward(x2, params)
    assert out2.shape == (B2, NUM_ACTIONS), out2.shape
    assert jnp.allclose(out2, ref2, atol=1e-5, rtol=1e-5)

    print("KERNEL_OK")
</pallas_src>

<mosaic_0001>
module attributes {stable_mosaic.version = 11 : i64} {
  func.func @_mlp_kernel(%arg0: i32, %arg1: memref<8x11xf32, #tpu.memory_space<vmem>>, %arg2: memref<11x128xf32, #tpu.memory_space<vmem>>, %arg3: memref<1x128xf32, #tpu.memory_space<vmem>>, %arg4: memref<128x128xf32, #tpu.memory_space<vmem>>, %arg5: memref<1x128xf32, #tpu.memory_space<vmem>>, %arg6: memref<128x128xf32, #tpu.memory_space<vmem>>, %arg7: memref<1x128xf32, #tpu.memory_space<vmem>>, %arg8: memref<8x128xf32, #tpu.memory_space<vmem>>) attributes {dimension_semantics = [#tpu.dimension_semantics<parallel>], iteration_bounds = array<i64: 1>, scalar_prefetch = 0 : i64, scratch_operands = 0 : i64, tpu.core_type = #tpu.core_type<tc>, window_params = [{transform_indices = @transform_0, window_bounds = array<i64: 8, 11>}, {pipeline_mode = #tpu.pipeline_mode<synchronous>, transform_indices = @transform_1, window_bounds = array<i64: 11, 128>}, {pipeline_mode = #tpu.pipeline_mode<synchronous>, transform_indices = @transform_2, window_bounds = array<i64: 1, 128>}, {pipeline_mode = #tpu.pipeline_mode<synchronous>, transform_indices = @transform_3, window_bounds = array<i64: 128, 128>}, {pipeline_mode = #tpu.pipeline_mode<synchronous>, transform_indices = @transform_4, window_bounds = array<i64: 1, 128>}, {pipeline_mode = #tpu.pipeline_mode<synchronous>, transform_indices = @transform_5, window_bounds = array<i64: 128, 128>}, {pipeline_mode = #tpu.pipeline_mode<synchronous>, transform_indices = @transform_6, window_bounds = array<i64: 1, 128>}, {transform_indices = @transform_7, window_bounds = array<i64: 8, 128>}]} {
    %c0 = arith.constant 0 : index
    %c0_0 = arith.constant 0 : index
    %0 = vector.load %arg1[%c0, %c0_0] : memref<8x11xf32, #tpu.memory_space<vmem>>, vector<8x11xf32>
    %c0_1 = arith.constant 0 : index
    %c0_2 = arith.constant 0 : index
    %1 = vector.load %arg2[%c0_1, %c0_2] : memref<11x128xf32, #tpu.memory_space<vmem>>, vector<11x128xf32>
    %cst = arith.constant dense<0.000000e+00> : vector<8x128xf32>
    %2 = tpu.matmul %0, %1, %cst {dimension_numbers = #tpu.dot_dimension_numbers<[1], [0], [0], [1], [0, 0, 1, 1], [], []>} : vector<8x11xf32>, vector<11x128xf32>, vector<8x128xf32> -> vector<8x128xf32>
    %c0_3 = arith.constant 0 : index
    %c0_4 = arith.constant 0 : index
    %3 = vector.load %arg3[%c0_3, %c0_4] : memref<1x128xf32, #tpu.memory_space<vmem>>, vector<1x128xf32>
    %4 = vector.broadcast %3 : vector<1x128xf32> to vector<8x128xf32>
    %5 = arith.addf %2, %4 : vector<8x128xf32>
    %cst_5 = arith.constant 0.000000e+00 : f32
    %6 = vector.broadcast %cst_5 : f32 to vector<8x128xf32>
    %7 = arith.maximumf %5, %6 : vector<8x128xf32>
    %c0_6 = arith.constant 0 : index
    %c0_7 = arith.constant 0 : index
    %8 = vector.load %arg4[%c0_6, %c0_7] : memref<128x128xf32, #tpu.memory_space<vmem>>, vector<128x128xf32>
    %cst_8 = arith.constant dense<0.000000e+00> : vector<8x128xf32>
    %9 = tpu.matmul %7, %8, %cst_8 {dimension_numbers = #tpu.dot_dimension_numbers<[1], [0], [0], [1], [0, 0, 1, 1], [], []>} : vector<8x128xf32>, vector<128x128xf32>, vector<8x128xf32> -> vector<8x128xf32>
    %c0_9 = arith.constant 0 : index
    %c0_10 = arith.constant 0 : index
    %10 = vector.load %arg5[%c0_9, %c0_10] : memref<1x128xf32, #tpu.memory_space<vmem>>, vector<1x128xf32>
    %11 = vector.broadcast %10 : vector<1x128xf32> to vector<8x128xf32>
    %12 = arith.addf %9, %11 : vector<8x128xf32>
    %cst_11 = arith.constant 0.000000e+00 : f32
    %13 = vector.broadcast %cst_11 : f32 to vector<8x128xf32>
    %14 = arith.maximumf %12, %13 : vector<8x128xf32>
    %c0_12 = arith.constant 0 : index
    %c0_13 = arith.constant 0 : index
    %15 = vector.load %arg6[%c0_12, %c0_13] : memref<128x128xf32, #tpu.memory_space<vmem>>, vector<128x128xf32>
    %cst_14 = arith.constant dense<0.000000e+00> : vector<8x128xf32>
    %16 = tpu.matmul %14, %15, %cst_14 {dimension_numbers = #tpu.dot_dimension_numbers<[1], [0], [0], [1], [0, 0, 1, 1], [], []>} : vector<8x128xf32>, vector<128x128xf32>, vector<8x128xf32> -> vector<8x128xf32>
    %c0_15 = arith.constant 0 : index
    %c0_16 = arith.constant 0 : index
    %17 = vector.load %arg7[%c0_15, %c0_16] : memref<1x128xf32, #tpu.memory_space<vmem>>, vector<1x128xf32>
    %18 = vector.broadcast %17 : vector<1x128xf32> to vector<8x128xf32>
    %19 = arith.addf %16, %18 : vector<8x128xf32>
    %c0_17 = arith.constant 0 : index
    %c0_18 = arith.constant 0 : index
    %20 = vector.load %arg8[%c0_17, %c0_18] : memref<8x128xf32, #tpu.memory_space<vmem>>, vector<8x128xf32>
    tpu.vector_store %arg8[%c0_17, %c0_18], %19 {strides = array<i32>} : memref<8x128xf32, #tpu.memory_space<vmem>>, vector<8x128xf32>,
    return
  }
  func.func @transform_0(%arg0: i32) -> (i32, i32) {
    %c0_i32 = arith.constant 0 : i32
    %c0_i32_0 = arith.constant 0 : i32
    return %arg0, %c0_i32 : i32, i32
  }
  func.func @transform_1(%arg0: i32) -> (i32, i32) {
    %c0_i32 = arith.constant 0 : i32
    %c0_i32_0 = arith.constant 0 : i32
    %c0_i32_1 = arith.constant 0 : i32
    return %c0_i32, %c0_i32_0 : i32, i32
  }
  func.func @transform_2(%arg0: i32) -> (i32, i32) {
    %c0_i32 = arith.constant 0 : i32
    %c0_i32_0 = arith.constant 0 : i32
    %c0_i32_1 = arith.constant 0 : i32
    return %c0_i32, %c0_i32_0 : i32, i32
  }
  func.func @transform_3(%arg0: i32) -> (i32, i32) {
    %c0_i32 = arith.constant 0 : i32
    %c0_i32_0 = arith.constant 0 : i32
    %c0_i32_1 = arith.constant 0 : i32
    return %c0_i32, %c0_i32_0 : i32, i32
  }
  func.func @transform_4(%arg0: i32) -> (i32, i32) {
    %c0_i32 = arith.constant 0 : i32
    %c0_i32_0 = arith.constant 0 : i32
    %c0_i32_1 = arith.constant 0 : i32
    return %c0_i32, %c0_i32_0 : i32, i32
  }
  func.func @transform_5(%arg0: i32) -> (i32, i32) {
    %c0_i32 = arith.constant 0 : i32
    %c0_i32_0 = arith.constant 0 : i32
    %c0_i32_1 = arith.constant 0 : i32
    return %c0_i32, %c0_i32_0 : i32, i32
  }
  func.func @transform_6(%arg0: i32) -> (i32, i32) {
    %c0_i32 = arith.constant 0 : i32
    %c0_i32_0 = arith.constant 0 : i32
    %c0_i32_1 = arith.constant 0 : i32
    return %c0_i32, %c0_i32_0 : i32, i32
  }
  func.func @transform_7(%arg0: i32) -> (i32, i32) {
    %c0_i32 = arith.constant 0 : i32
    %c0_i32_0 = arith.constant 0 : i32
    return %arg0, %c0_i32 : i32, i32
  }
}

</mosaic_0001>

<bundles_post_ra>
// kernel: reacher_dqn_forward.1
= control target key start
LH: loop header
LB: loop body
LE: loop exit
PB: predicated region body
PF: predicated region fallthrough
CT: control target
= control target key end

     0   :  { %12 = vsyncpa [#allocation3], 0  ;;  %s746_s0 = inlined_call_operand.hbm [shape: f32[2,11], index: 0, kind: input, shape index: {}]   ;;  %s747_s1 = inlined_call_operand.hbm [shape: f32[11,128], index: 1, kind: input, shape index: {}]   ;;  %s748_s2 = inlined_call_operand.vmem [shape: f32[1,128], index: 2, kind: input, shape index: {}]   ;;  %s749_s3 = inlined_call_operand.hbm [shape: f32[128,128], index: 3, kind: input, shape index: {}]   ;;  %s750_s4 = inlined_call_operand.vmem [shape: f32[1,128], index: 4, kind: input, shape index: {}]   ;;  %s751_s5 = inlined_call_operand.hbm [shape: f32[128,128], index: 5, kind: input, shape index: {}]   ;;  %s752_s6 = inlined_call_operand.vmem [shape: f32[1,128], index: 6, kind: input, shape index: {}]   ;;  %s753_s7 = inlined_call_operand.hbm [shape: f32[2,128], index: 7, kind: output, shape index: {}]  }
   0x1   :  { %13 = vsyncpa [#allocation6], 0 }
   0x2   :  { %14 = vsyncpa [#allocation9], 0 }
   0x3   :  { %15 = vsyncpa [#allocation4], 0 }
   0x4   :  { %20 = vsyncadd [#allocation3], 96  ;;  %s616_s24 = smov [#allocation5]  }
   0x5   :  { %s33_s25 = sshll.u32 %s616_s24, 4  ;;  %s34_s25 = int_to_ptr.vmem [resolvable:$true] %s33_s25 }
   0x6   :  { %s516_s26 = scalar_lea.vmem %s34_s25, 256  ;;  %p521_p1 = scmp.lt.s32.totalorder %s34_s25, %s34_s25 }
   0x7   :  { %p517_p0 = scmp.ne.s32.totalorder %s34_s25, %s516_s26  ;;  %p522_p2 = scmp.lt.s32.totalorder %s516_s26, %s516_s26 }
   0x9   :  { %p523_p3 = por %p522_p2, %p521_p1 }
   0xb   :  { %p524_p4 = pnand %p523_p3, %p517_p0 }
   0xd   :  { %527 = shalt.err (!%p524_p4)
}
   0xe   :  { %s617_s27 = smov 128   ;;  %s618_s28 = smov 8  }
   0xf   :  { %39 = dma.hbm_to_vmem [thread:$0]  %s747_s1, 256, %s34_s25, [#allocation6], %s617_s27, %s617_s27, %s618_s28  }
  0x10   :  { %s619_s8 = smov [#allocation2]  }
  0x11   :  { %s21_s9 = sshll.u32 %s619_s8, 4  ;;  %s22_s9 = int_to_ptr.vmem [resolvable:$true] %s21_s9 }
  0x12   :  { %s536_s10 = scalar_lea.vmem %s22_s9, 32  ;;  %s540_s11 = scalar_lea.vmem %s22_s9, 128 }
  0x13   :  { %p537_p5 = scmp.ne.s32.totalorder %s22_s9, %s536_s10  ;;  %p541_p6 = scmp.lt.s32.totalorder %s22_s9, %s22_s9 }
  0x14   :  { %p542_p7 = scmp.lt.s32.totalorder %s540_s11, %s536_s10 }
  0x16   :  { %p543_p8 = por %p542_p7, %p541_p6 }
  0x18   :  { %p544_p9 = pnand %p543_p8, %p537_p5 }
  0x1a   :  { %547 = shalt.err (!%p544_p9)
}
  0x1b   :  { %s620_s12 = smov 32   ;;  %s621_s13 = smov 2  }
  0x1c   :  { %27 = dma.hbm_to_vmem [thread:$0]  %s746_s0, 32, %s22_s9, [#allocation3], %s620_s12, %s620_s12, %s621_s13  }
  0x1d   :  { %s622_s1 = smov [#allocation7]   ;;  %s623_s17 = smov [#allocation8]  }
  0x1e   :  { %s47_s16 = sshll.u32 %s622_s1, 4  ;;  %s61_s18 = sshll.u32 %s623_s17, 4  ;;  %s48_s16 = int_to_ptr.vmem [resolvable:$true] %s47_s16  ;;  %s62_s18 = int_to_ptr.vmem [resolvable:$true] %s61_s18 }
  0x1f   :  { %s556_s19 = scalar_lea.vmem %s48_s16, 2048  ;;  %p561_p11 = scmp.lt.s32.totalorder %s48_s16, %s48_s16 }
  0x20   :  { %p557_p10 = scmp.ne.s32.totalorder %s48_s16, %s556_s19  ;;  %p562_p12 = scmp.lt.s32.totalorder %s556_s19, %s556_s19 }
  0x22   :  { %p563_p13 = por %p562_p12, %p561_p11 }
  0x24   :  { %p564_p0 = pnand %p563_p13, %p557_p10 }
  0x26   :  { %567 = shalt.err (!%p564_p0)
}
  0x27   :  { %53 = dma.hbm_to_vmem [thread:$0]  %s749_s3, 2048, %s48_s16, [#allocation6], %s617_s27, %s617_s27, %s618_s28  }
  0x28   :  { %s576_s0 = scalar_lea.vmem %s62_s18, 2048  ;;  %p581_p2 = scmp.lt.s32.totalorder %s62_s18, %s62_s18 }
  0x29   :  { %p577_p1 = scmp.ne.s32.totalorder %s62_s18, %s576_s0  ;;  %p582_p3 = scmp.lt.s32.totalorder %s576_s0, %s576_s0 }
  0x2b   :  { %p583_p4 = por %p582_p3, %p581_p2 }
  0x2d   :  { %p584_p5 = pnand %p583_p4, %p577_p1 }
  0x2f   :  { %587 = shalt.err (!%p584_p5)
}
  0x30   :  { %67 = dma.hbm_to_vmem [thread:$0]  %s751_s5, 2048, %s62_s18, [#allocation9], %s617_s27, %s617_s27, %s618_s28  }
  0x31   :  { %608 = dma.done.wait [#allocation3], 128  }
  0x32   :  { %609 = vsyncadd [#allocation3], 4294967168 }
  0x33   :  { %610 = dma.done.wait [#allocation6], 2304  }
  0x34   :  { %611 = vsyncadd [#allocation6], 4294964992 }
  0x35   :  { %612 = dma.done.wait [#allocation9], 2048  }
  0x36   :  { %613 = vsyncadd [#allocation9], 4294965248  ;;  %v624_v0 = vmov 0.0   ;;  %vm625_vm0 = vmmov 0   ;;  %vm96_vm1 = vcmask 1042432   ;;  %v83_v2 = vld [vmem:[#allocation5] sm:$0xff] }
  0x37   :  { %420 = vmatprep.subr.mxu0 %v624_v0  ;;  %424 = vmatprep.mubr.msk.f32.mxu0 %vm625_vm0, %v624_v0  ;;  %v84_v1 = vld [vmem:[#allocation5 + $0x8] sm:$0x7]  ;;  %v82_v3 = vld [vmem:[#allocation2] sm:$0xff]  ;;  %vm92_vm2 = vcmask 89088   ;;  %v185_v5 = vld [vmem:[#allocation7 + $0x70] sm:$0xff] }
  0x38   :  { %427 = vmatprep.subr.mxu1 %v624_v0  ;;  %459 = vmatprep.mubr.msk.f32.mxu1 %vm625_vm0, %v624_v0  ;;  %v186_v4 = vld [vmem:[#allocation7 + $0x78] sm:$0xff]  ;;  %v184_v6 = vld [vmem:[#allocation7 + $0x68] sm:$0xff]  ;;  %v183_v7 = vld [vmem:[#allocation7 + $0x60] sm:$0xff] }
  0x39   :  { %421 = vmatpush3.msk.msra.mxu0 %vm96_vm1, %v84_v1  ;;  %428 = vmatpush3.msra.mxu1 %v186_v4  ;;  %v182_v8 = vld [vmem:[#allocation7 + $0x58] sm:$0xff]  ;;  %v181_v9 = vld [vmem:[#allocation7 + $0x50] sm:$0xff]  ;;  %v180_v10 = vld [vmem:[#allocation7 + $0x48] sm:$0xff] }
  0x3a   :  { %422 = vmatprep.subr.mxu0 %v624_v0  ;;  %429 = vmatprep.subr.mxu1 %v624_v0  ;;  %v179_v11 = vld [vmem:[#allocation7 + $0x40] sm:$0xff]  ;;  %v178_v12 = vld [vmem:[#allocation7 + $0x38] sm:$0xff]  ;;  %v177_v13 = vld [vmem:[#allocation7 + $0x30] sm:$0xff] }
  0x3b   :  { %423 = vmatpush3.msra.mxu0 %v83_v2  ;;  %430 = vmatpush3.msra.mxu1 %v185_v5  ;;  %v176_v14 = vld [vmem:[#allocation7 + $0x28] sm:$0xff]  ;;  %v175_v15 = vld [vmem:[#allocation7 + $0x20] sm:$0xff]  ;;  %v174_v16 = vld [vmem:[#allocation7 + $0x18] sm:$0xff] }
  0x3c   :  { %425 = vmatmul.mubr.msk.f32.vlgmr.msra.gmra.mxu0 %vm92_vm2, %v82_v3  ;;  %431 = vmatprep.subr.mxu1 %v624_v0  ;;  %v173_v17 = vld [vmem:[#allocation7 + $0x10] sm:$0xff]  ;;  %v172_v18 = vld [vmem:[#allocation7 + $0x8] sm:$0xff]  ;;  %v171_v19 = vld [vmem:[#allocation7] sm:$0xff] }
  0x3d   :  { %462 = vmatprep.subr.mxu0 %v624_v0  ;;  %432 = vmatpush3.msra.mxu1 %v184_v6  ;;  %v280_v20 = vld [vmem:[#allocation8 + $0x78] sm:$0xff]  ;;  %v279_v21 = vld [vmem:[#allocation8 + $0x70] sm:$0xff]  ;;  %v278_v22 = vld [vmem:[#allocation8 + $0x68] sm:$0xff] }
  0x3e   :  { %494 = vmatprep.mubr.msk.f32.mxu0 %vm625_vm0, %v624_v0  ;;  %433 = vmatprep.subr.mxu1 %v624_v0  ;;  %v277_v23 = vld [vmem:[#allocation8 + $0x60] sm:$0xff]  ;;  %v276_v24 = vld [vmem:[#allocation8 + $0x58] sm:$0xff]  ;;  %v275_v25 = vld [vmem:[#allocation8 + $0x50] sm:$0xff] }
  0x3f   :  { %434 = vmatpush3.msra.mxu1 %v183_v7  ;;  %463 = vmatpush3.msra.mxu0 %v280_v20  ;;  %v274_v26 = vld [vmem:[#allocation8 + $0x48] sm:$0xff]  ;;  %v273_v27 = vld [vmem:[#allocation8 + $0x40] sm:$0xff]  ;;  %v272_v28 = vld [vmem:[#allocation8 + $0x38] sm:$0xff] }
  0x40   :  { %435 = vmatprep.subr.mxu1 %v624_v0  ;;  %464 = vmatprep.subr.mxu0 %v624_v0  ;;  %v271_v29 = vld [vmem:[#allocation8 + $0x30] sm:$0xff]  ;;  %v270_v30 = vld [vmem:[#allocation8 + $0x28] sm:$0xff]  ;;  %v269_v31 = vld [vmem:[#allocation8 + $0x20] sm:$0xff] }
  0x41   :  { %436 = vmatpush3.msra.mxu1 %v182_v8  ;;  %465 = vmatpush3.msra.mxu0 %v279_v21  ;;  %v268_v32 = vld [vmem:[#allocation8 + $0x18] sm:$0xff]  ;;  %v378_v33 = vld [vmem:[%s748_s2] ss:$0 sm:$0xff]  ;;  %v267_v38 = vld [vmem:[#allocation8 + $0x10] sm:$0xff] }
  0x42   :  { %437 = vmatprep.subr.mxu1 %v624_v0  ;;  %466 = vmatprep.subr.mxu0 %v624_v0  ;;  %v266_v39 = vld [vmem:[#allocation8 + $0x8] sm:$0xff]  ;;  %v265_v40 = vld [vmem:[#allocation8] sm:$0xff] }
  0x43   :  { %438 = vmatpush3.msra.mxu1 %v181_v9  ;;  %467 = vmatpush3.msra.mxu0 %v278_v22  ;;  %v381_v41 = vld [vmem:[%s750_s4] ss:$0 sm:$0xff] }
  0x44   :  { %439 = vmatprep.subr.mxu1 %v624_v0  ;;  %468 = vmatprep.subr.mxu0 %v624_v0  ;;  %v382_v46 = vld [vmem:[%s752_s6] ss:$0 sm:$0xff] }
  0x45   :  { %440 = vmatpush3.msra.mxu1 %v180_v10  ;;  %469 = vmatpush3.msra.mxu0 %v277_v23 }
  0x46   :  { %441 = vmatprep.subr.mxu1 %v624_v0  ;;  %470 = vmatprep.subr.mxu0 %v624_v0 }
  0x47   :  { %442 = vmatpush3.msra.mxu1 %v179_v11  ;;  %471 = vmatpush3.msra.mxu0 %v276_v24 }
  0x48   :  { %443 = vmatprep.subr.mxu1 %v624_v0  ;;  %472 = vmatprep.subr.mxu0 %v624_v0 }
  0x49   :  { %444 = vmatpush3.msra.mxu1 %v178_v12  ;;  %473 = vmatpush3.msra.mxu0 %v275_v25 }
  0x4a   :  { %445 = vmatprep.subr.mxu1 %v624_v0  ;;  %474 = vmatprep.subr.mxu0 %v624_v0 }
  0x4b   :  { %446 = vmatpush3.msra.mxu1 %v177_v13  ;;  %475 = vmatpush3.msra.mxu0 %v274_v26 }
  0x4c   :  { %447 = vmatprep.subr.mxu1 %v624_v0  ;;  %476 = vmatprep.subr.mxu0 %v624_v0 }
  0x4d   :  { %448 = vmatpush3.msra.mxu1 %v176_v14  ;;  %477 = vmatpush3.msra.mxu0 %v273_v27 }
  0x4e   :  { %449 = vmatprep.subr.mxu1 %v624_v0  ;;  %478 = vmatprep.subr.mxu0 %v624_v0 }
  0x4f   :  { %450 = vmatpush3.msra.mxu1 %v175_v15  ;;  %479 = vmatpush3.msra.mxu0 %v272_v28 }
  0x50   :  { %451 = vmatprep.subr.mxu1 %v624_v0  ;;  %480 = vmatprep.subr.mxu0 %v624_v0 }
  0x51   :  { %452 = vmatpush3.msra.mxu1 %v174_v16  ;;  %481 = vmatpush3.msra.mxu0 %v271_v29 }
  0x52   :  { %453 = vmatprep.subr.mxu1 %v624_v0  ;;  %482 = vmatprep.subr.mxu0 %v624_v0 }
  0x53   :  { %454 = vmatpush3.msra.mxu1 %v173_v17  ;;  %483 = vmatpush3.msra.mxu0 %v270_v30 }
  0x54   :  { %455 = vmatprep.subr.mxu1 %v624_v0  ;;  %484 = vmatprep.subr.mxu0 %v624_v0 }
  0x55   :  { %456 = vmatpush3.msra.mxu1 %v172_v18  ;;  %485 = vmatpush3.msra.mxu0 %v269_v31 }
  0x56   :  { %457 = vmatprep.subr.mxu1 %v624_v0  ;;  %486 = vmatprep.subr.mxu0 %v624_v0 }
  0x57   :  { %458 = vmatpush3.msra.mxu1 %v171_v19  ;;  %487 = vmatpush3.msra.mxu0 %v268_v32 }
  0x58   :  { %488 = vmatprep.subr.mxu0 %v624_v0 }
  0x59   :  { %489 = vmatpush3.msra.mxu0 %v267_v38 }
  0x5a   :  { %490 = vmatprep.subr.mxu0 %v624_v0 }
  0x5b   :  { %491 = vmatpush3.msra.mxu0 %v266_v39 }
  0x5c   :  { %492 = vmatprep.subr.mxu0 %v624_v0 }
  0x5d   :  { %493 = vmatpush3.msra.mxu0 %v265_v40 }
  0xfc   :  { %v166_v34 = vpop.f32.mrf.mxu0 }
  0xfd   :  { %v167_v35 = vadd.f32 %v378_v33, %v166_v34 }
  0xfe   :  { %v426_v36 = vpop.f32.mrf.mxu0 }
  0xff   :  { %v170_v37 = vmax.f32 %v167_v35, 0.0 }
 0x101   :  { %460 = vmatmul.mubr.f32.vlgmr.msra.gmra.mxu1 %v170_v37 }
 0x1c1   :  { %v260_v42 = vpop.f32.mrf.mxu1 }
 0x1c2   :  { %v261_v43 = vadd.f32 %v381_v41, %v260_v42 }
 0x1c3   :  { %v461_v44 = vpop.f32.mrf.mxu1 }
 0x1c4   :  { %v264_v45 = vmax.f32 %v261_v43, 0.0 }
 0x1c6   :  { %495 = vmatmul.mubr.f32.vlgmr.msra.gmra.mxu0 %v264_v45 }
 0x286   :  { %v354_v47 = vpop.f32.mrf.mxu0 }
 0x287   :  { %v355_v48 = vadd.f32 %v382_v46, %v354_v47 }
 0x288   :  { %v496_v49 = vpop.f32.mrf.mxu0 }
 0x289   :  { %358 = vst [vmem:[#allocation10] sm:$0xff] %v355_v48 }
 0x28a   :  { %363 = vsyncadd [#allocation4], 96  ;;  %s626_s27 = smov [#allocation10]  }
 0x28b   :  { %s364_s28 = sshll.u32 %s626_s27, 4  ;;  %s365_s28 = int_to_ptr.vmem [resolvable:$true] %s364_s28 }
 0x28c   :  { %s588_s29 = scalar_lea.vmem %s365_s28, 32  ;;  %s592_s4 = scalar_lea.vmem %s365_s28, 128 }
 0x28d   :  { %p589_p6 = scmp.ne.s32.totalorder %s365_s28, %s588_s29  ;;  %p593_p7 = scmp.lt.s32.totalorder %s365_s28, %s365_s28 }
 0x28e   :  { %p594_p8 = scmp.lt.s32.totalorder %s592_s4, %s588_s29 }
 0x290   :  { %p595_p9 = por %p594_p8, %p593_p7 }
 0x292   :  { %p596_p10 = pnand %p595_p9, %p589_p6 }
 0x294   :  { %599 = shalt.err (!%p596_p10)
}
 0x295   :  { %370 = dma.vmem_to_hbm [thread:$0]  %s365_s28, 32, %s753_s7, [#allocation4], %s620_s12, %s620_s12, %s621_s13  }
 0x296   :  { %614 = dma.done.wait [#allocation4], 128  }
 0x297   :  { %615 = vsyncadd [#allocation4], 4294967168 }
 0x298   :  { %374 = vsyncpa [#allocation3], 1 }
 0x299   :  { %375 = vsyncpa [#allocation6], 1 }
 0x29a   :  { %376 = vsyncpa [#allocation9], 1 }
 0x29b   :  { %377 = vsyncpa [#allocation4], 1 }

</bundles_post_ra>
